<compile_context>
chip_gen: v7x
topology: tpu7x:2x2x1
jax: 0.10.0
libtpu: 0.0.40
codegen_flags: <defaults>
</compile_context>

<pallas_src>
import math

import jax
import jax.numpy as jnp
from jax.experimental import pallas as pl
from jax.experimental.pallas import tpu as pltpu

NEG_SLOPE = 0.01       # PyTorch nn.LeakyReLU default negative_slope
TILE_B_MAX = 2048      # batch tile cap; VMEM footprint is tiny at these widths
SUBLANE = 8            # f32 sublane granule (output column padding)
MIN_TILE = 16          # bf16 sublane packing granule for the batch (row) axis


def _round_up(x, m):
    return ((x + m - 1) // m) * m


def _leaky_relu(x):
    return jnp.where(x > 0, x, NEG_SLOPE * x)


def _mtl_kernel(x_ref, w0_ref, b0_ref, w1_ref, b1_ref, wt_ref, bt_ref, out_ref):
    # shared layer 0: Linear + LeakyReLU   (bf16 MXU inputs, f32 accumulate)
    h = jnp.dot(x_ref[...], w0_ref[...], preferred_element_type=jnp.float32)
    h = _leaky_relu(h + b0_ref[...])

    # shared layer 1: Dropout (identity in eval) + Linear + LeakyReLU
    h = jnp.dot(h.astype(jnp.bfloat16), w1_ref[...],
                preferred_element_type=jnp.float32)
    h = _leaky_relu(h + b1_ref[...])

    # fused task heads: [tile_b, H1] @ [H1, out_pad] + bias
    out = jnp.dot(h.astype(jnp.bfloat16), wt_ref[...],
                  preferred_element_type=jnp.float32)
    out_ref[...] = (out + bt_ref[...]).astype(out_ref.dtype)


def multi_task_net_forward(x, params):
    """Fused multi-task MLP forward. Returns a single (batch, num_tasks) f32 array."""
    w0, b0, w1, b1, wt, bt = params
    batch, input_size = x.shape
    h0 = w0.shape[1]
    h1 = w1.shape[1]
    num_tasks = wt.shape[1]

    # --- narrow, sublane-padded output (block last-dim == full array dim => legal) ---
    out_pad = _round_up(num_tasks, SUBLANE)
    wt_p = jnp.zeros((h1, out_pad), jnp.float32).at[:, :num_tasks].set(wt)
    bt_p = jnp.zeros((1, out_pad), jnp.float32).at[:, :num_tasks].set(bt)

    # --- bf16 MXU operands; biases / accumulation stay f32 ---
    x_bf = x.astype(jnp.bfloat16)
    w0_bf = w0.astype(jnp.bfloat16)
    w1_bf = w1.astype(jnp.bfloat16)
    wt_bf = wt_p.astype(jnp.bfloat16)

    # --- batch tiling: minimize padding, ensure >=2 grid steps when batch allows ---
    n_tiles = max(pl.cdiv(batch, TILE_B_MAX), 2 if batch >= 2 * MIN_TILE else 1)
    tile_b = _round_up(pl.cdiv(batch, n_tiles), MIN_TILE)
    padded_batch = _round_up(batch, tile_b)
    if padded_batch != batch:
        x_bf = jnp.pad(x_bf, ((0, padded_batch - batch), (0, 0)))
    grid = (padded_batch // tile_b,)

    out = pl.pallas_call(
        _mtl_kernel,
        out_shape=jax.ShapeDtypeStruct((padded_batch, out_pad), jnp.float32),
        grid=grid,
        in_specs=[
            pl.BlockSpec((tile_b, input_size), lambda i: (i, 0)),   # x: streamed per tile
            pl.BlockSpec((input_size, h0), lambda i: (0, 0)),       # W0: VMEM-resident
            pl.BlockSpec((1, h0), lambda i: (0, 0)),                # b0
            pl.BlockSpec((h0, h1), lambda i: (0, 0)),               # W1
            pl.BlockSpec((1, h1), lambda i: (0, 0)),                # b1
            pl.BlockSpec((h1, out_pad), lambda i: (0, 0)),          # fused task weights (padded)
            pl.BlockSpec((1, out_pad), lambda i: (0, 0)),           # fused task bias (padded)
        ],
        out_specs=pl.BlockSpec((tile_b, out_pad), lambda i: (i, 0)),
        compiler_params=pltpu.CompilerParams(
            dimension_semantics=("parallel",),
        ),
    )(x_bf, w0_bf, b0, w1_bf, b1, wt_bf, bt_p)

    # Single slice to drop batch padding and zero task columns.
    if padded_batch != batch or out_pad != num_tasks:
        out = out[:batch, :num_tasks]
    return out


def multi_task_net_forward_list(x, params):
    """Module-parity wrapper: returns a list of num_tasks arrays of shape [batch, 1]."""
    out = multi_task_net_forward(x, params)
    num_tasks = out.shape[1]
    return [out[:, t:t + 1] for t in range(num_tasks)]


def init_params(key, input_size, hidden_sizes, num_tasks):
    """Deterministic init mimicking PyTorch nn.Linear (uniform +/- 1/sqrt(fan_in))."""
    keys = jax.random.split(key, 6)

    def linear_init(kw, kb, fan_in, fan_out):
        bound = 1.0 / math.sqrt(fan_in)
        w = jax.random.uniform(kw, (fan_in, fan_out), jnp.float32, -bound, bound)
        b = jax.random.uniform(kb, (1, fan_out), jnp.float32, -bound, bound)
        return w, b

    w0, b0 = linear_init(keys[0], keys[1], input_size, hidden_sizes[0])
    w1, b1 = linear_init(keys[2], keys[3], hidden_sizes[0], hidden_sizes[1])
    # Fused task heads: num_tasks independent Linear(hidden[-1], 1) layers stacked
    # column-wise into a single [hidden[-1], num_tasks] weight.
    wt, bt = linear_init(keys[4], keys[5], hidden_sizes[1], num_tasks)
    return (w0, b0, w1, b1, wt, bt)


if __name__ == "__main__":
    # Small shapes consistent with the module's forward.
    batch = 8
    input_size = 32
    hidden_sizes = [64, 32]
    num_tasks = 3
    dropout_rate = 0.1  # unused in eval-mode forward

    key = jax.random.PRNGKey(0)
    k_x, k_p = jax.random.split(key)

    x = jax.random.normal(k_x, (batch, input_size), dtype=jnp.float32)
    params = init_params(k_p, input_size, hidden_sizes, num_tasks)

    outputs = multi_task_net_forward_list(x, params)
    outputs = [jax.block_until_ready(o) for o in outputs]

    # Sanity: reference in plain JAX f32 (same eval-mode semantics). Tolerances
    # relaxed because the kernel runs bf16 MXU inputs with f32 accumulation.
    w0, b0, w1, b1, wt, bt = params
    h = x @ w0 + b0
    h = jnp.where(h > 0, h, NEG_SLOPE * h)
    h = h @ w1 + b1
    h = jnp.where(h > 0, h, NEG_SLOPE * h)
    ref = h @ wt + bt
    for t, o in enumerate(outputs):
        assert o.shape == (batch, 1), o.shape
        assert jnp.allclose(o[:, 0], ref[:, t], atol=2e-2, rtol=2e-2), f"task {t} mismatch"

    print("KERNEL_OK")
</pallas_src>

<mosaic_0001>
module attributes {stable_mosaic.version = 11 : i64} {
  func.func @_mtl_kernel(%arg0: i32, %arg1: memref<16x32xbf16, #tpu.memory_space<vmem>>, %arg2: memref<32x64xbf16, #tpu.memory_space<vmem>>, %arg3: memref<1x64xf32, #tpu.memory_space<vmem>>, %arg4: memref<64x32xbf16, #tpu.memory_space<vmem>>, %arg5: memref<1x32xf32, #tpu.memory_space<vmem>>, %arg6: memref<32x8xbf16, #tpu.memory_space<vmem>>, %arg7: memref<1x8xf32, #tpu.memory_space<vmem>>, %arg8: memref<16x8xf32, #tpu.memory_space<vmem>>) attributes {dimension_semantics = [#tpu.dimension_semantics<parallel>], iteration_bounds = array<i64: 1>, scalar_prefetch = 0 : i64, scratch_operands = 0 : i64, tpu.core_type = #tpu.core_type<tc>, window_params = [{transform_indices = @transform_0, window_bounds = array<i64: 16, 32>}, {pipeline_mode = #tpu.pipeline_mode<synchronous>, transform_indices = @transform_1, window_bounds = array<i64: 32, 64>}, {pipeline_mode = #tpu.pipeline_mode<synchronous>, transform_indices = @transform_2, window_bounds = array<i64: 1, 64>}, {pipeline_mode = #tpu.pipeline_mode<synchronous>, transform_indices = @transform_3, window_bounds = array<i64: 64, 32>}, {pipeline_mode = #tpu.pipeline_mode<synchronous>, transform_indices = @transform_4, window_bounds = array<i64: 1, 32>}, {pipeline_mode = #tpu.pipeline_mode<synchronous>, transform_indices = @transform_5, window_bounds = array<i64: 32, 8>}, {pipeline_mode = #tpu.pipeline_mode<synchronous>, transform_indices = @transform_6, window_bounds = array<i64: 1, 8>}, {transform_indices = @transform_7, window_bounds = array<i64: 16, 8>}]} {
    %c0 = arith.constant 0 : index
    %c0_0 = arith.constant 0 : index
    %0 = vector.load %arg1[%c0, %c0_0] : memref<16x32xbf16, #tpu.memory_space<vmem>>, vector<16x32xbf16>
    %c0_1 = arith.constant 0 : index
    %c0_2 = arith.constant 0 : index
    %1 = vector.load %arg2[%c0_1, %c0_2] : memref<32x64xbf16, #tpu.memory_space<vmem>>, vector<32x64xbf16>
    %cst = arith.constant dense<0.000000e+00> : vector<16x64xf32>
    %2 = tpu.matmul %0, %1, %cst {dimension_numbers = #tpu.dot_dimension_numbers<[1], [0], [0], [1], [0, 0, 1, 1], [], []>} : vector<16x32xbf16>, vector<32x64xbf16>, vector<16x64xf32> -> vector<16x64xf32>
    %c0_3 = arith.constant 0 : index
    %c0_4 = arith.constant 0 : index
    %3 = vector.load %arg3[%c0_3, %c0_4] : memref<1x64xf32, #tpu.memory_space<vmem>>, vector<1x64xf32>
    %4 = vector.broadcast %3 : vector<1x64xf32> to vector<16x64xf32>
    %5 = arith.addf %2, %4 : vector<16x64xf32>
    %cst_5 = arith.constant 0.000000e+00 : f32
    %6 = vector.broadcast %cst_5 : f32 to vector<16x64xf32>
    %7 = arith.cmpf ogt, %5, %6 : vector<16x64xf32>
    %cst_6 = arith.constant 0.00999999977 : f32
    %8 = vector.broadcast %cst_6 : f32 to vector<16x64xf32>
    %9 = arith.mulf %8, %5 : vector<16x64xf32>
    %10 = arith.select %7, %5, %9 : vector<16x64xi1>, vector<16x64xf32>
    %11 = arith.truncf %10 : vector<16x64xf32> to vector<16x64xbf16>
    %c0_7 = arith.constant 0 : index
    %c0_8 = arith.constant 0 : index
    %12 = vector.load %arg4[%c0_7, %c0_8] : memref<64x32xbf16, #tpu.memory_space<vmem>>, vector<64x32xbf16>
    %cst_9 = arith.constant dense<0.000000e+00> : vector<16x32xf32>
    %13 = tpu.matmul %11, %12, %cst_9 {dimension_numbers = #tpu.dot_dimension_numbers<[1], [0], [0], [1], [0, 0, 1, 1], [], []>} : vector<16x64xbf16>, vector<64x32xbf16>, vector<16x32xf32> -> vector<16x32xf32>
    %c0_10 = arith.constant 0 : index
    %c0_11 = arith.constant 0 : index
    %14 = vector.load %arg5[%c0_10, %c0_11] : memref<1x32xf32, #tpu.memory_space<vmem>>, vector<1x32xf32>
    %15 = vector.broadcast %14 : vector<1x32xf32> to vector<16x32xf32>
    %16 = arith.addf %13, %15 : vector<16x32xf32>
    %cst_12 = arith.constant 0.000000e+00 : f32
    %17 = vector.broadcast %cst_12 : f32 to vector<16x32xf32>
    %18 = arith.cmpf ogt, %16, %17 : vector<16x32xf32>
    %cst_13 = arith.constant 0.00999999977 : f32
    %19 = vector.broadcast %cst_13 : f32 to vector<16x32xf32>
    %20 = arith.mulf %19, %16 : vector<16x32xf32>
    %21 = arith.select %18, %16, %20 : vector<16x32xi1>, vector<16x32xf32>
    %22 = arith.truncf %21 : vector<16x32xf32> to vector<16x32xbf16>
    %c0_14 = arith.constant 0 : index
    %c0_15 = arith.constant 0 : index
    %23 = vector.load %arg6[%c0_14, %c0_15] : memref<32x8xbf16, #tpu.memory_space<vmem>>, vector<32x8xbf16>
    %cst_16 = arith.constant dense<0.000000e+00> : vector<16x8xf32>
    %24 = tpu.matmul %22, %23, %cst_16 {dimension_numbers = #tpu.dot_dimension_numbers<[1], [0], [0], [1], [0, 0, 1, 1], [], []>} : vector<16x32xbf16>, vector<32x8xbf16>, vector<16x8xf32> -> vector<16x8xf32>
    %c0_17 = arith.constant 0 : index
    %c0_18 = arith.constant 0 : index
    %25 = vector.load %arg7[%c0_17, %c0_18] : memref<1x8xf32, #tpu.memory_space<vmem>>, vector<1x8xf32>
    %26 = vector.broadcast %25 : vector<1x8xf32> to vector<16x8xf32>
    %27 = arith.addf %24, %26 : vector<16x8xf32>
    %c0_19 = arith.constant 0 : index
    %c0_20 = arith.constant 0 : index
    %28 = vector.load %arg8[%c0_19, %c0_20] : memref<16x8xf32, #tpu.memory_space<vmem>>, vector<16x8xf32>
    tpu.vector_store %arg8[%c0_19, %c0_20], %27 {strides = array<i32>} : memref<16x8xf32, #tpu.memory_space<vmem>>, vector<16x8xf32>,
    return
  }
  func.func @transform_0(%arg0: i32) -> (i32, i32) {
    %c0_i32 = arith.constant 0 : i32
    %c0_i32_0 = arith.constant 0 : i32
    return %arg0, %c0_i32 : i32, i32
  }
  func.func @transform_1(%arg0: i32) -> (i32, i32) {
    %c0_i32 = arith.constant 0 : i32
    %c0_i32_0 = arith.constant 0 : i32
    %c0_i32_1 = arith.constant 0 : i32
    return %c0_i32, %c0_i32_0 : i32, i32
  }
  func.func @transform_2(%arg0: i32) -> (i32, i32) {
    %c0_i32 = arith.constant 0 : i32
    %c0_i32_0 = arith.constant 0 : i32
    %c0_i32_1 = arith.constant 0 : i32
    return %c0_i32, %c0_i32_0 : i32, i32
  }
  func.func @transform_3(%arg0: i32) -> (i32, i32) {
    %c0_i32 = arith.constant 0 : i32
    %c0_i32_0 = arith.constant 0 : i32
    %c0_i32_1 = arith.constant 0 : i32
    return %c0_i32, %c0_i32_0 : i32, i32
  }
  func.func @transform_4(%arg0: i32) -> (i32, i32) {
    %c0_i32 = arith.constant 0 : i32
    %c0_i32_0 = arith.constant 0 : i32
    %c0_i32_1 = arith.constant 0 : i32
    return %c0_i32, %c0_i32_0 : i32, i32
  }
  func.func @transform_5(%arg0: i32) -> (i32, i32) {
    %c0_i32 = arith.constant 0 : i32
    %c0_i32_0 = arith.constant 0 : i32
    %c0_i32_1 = arith.constant 0 : i32
    return %c0_i32, %c0_i32_0 : i32, i32
  }
  func.func @transform_6(%arg0: i32) -> (i32, i32) {
    %c0_i32 = arith.constant 0 : i32
    %c0_i32_0 = arith.constant 0 : i32
    %c0_i32_1 = arith.constant 0 : i32
    return %c0_i32, %c0_i32_0 : i32, i32
  }
  func.func @transform_7(%arg0: i32) -> (i32, i32) {
    %c0_i32 = arith.constant 0 : i32
    %c0_i32_0 = arith.constant 0 : i32
    return %arg0, %c0_i32 : i32, i32
  }
}

</mosaic_0001>

<bundles_post_ra>
// kernel: tpu_custom_call.1
= control target key start
LH: loop header
LB: loop body
LE: loop exit
PB: predicated region body
PF: predicated region fallthrough
CT: control target
= control target key end

     0   :  { %v339_v0 = vmov 0.0   ;;  %vm340_vm0 = vmmov 0   ;;  %vm57_vm1 = vcmask 261120   ;;  %vm148_vm4 = vcmask 523264   ;;  %s428_s1 = inlined_call_operand.vmem [shape: bf16[32,64], index: 1, kind: input, shape index: {}]   ;;  %s429_s3 = inlined_call_operand.vmem [shape: bf16[64,32], index: 3, kind: input, shape index: {}]   ;;  %s430_s0 = inlined_call_operand.vmem [shape: bf16[16,32], index: 0, kind: input, shape index: {}]   ;;  %s431_s2 = inlined_call_operand.vmem [shape: f32[1,64], index: 2, kind: input, shape index: {}]   ;;  %s432_s5 = inlined_call_operand.vmem [shape: bf16[32,8], index: 5, kind: input, shape index: {}]   ;;  %s433_s4 = inlined_call_operand.vmem [shape: f32[1,32], index: 4, kind: input, shape index: {}]   ;;  %s434_s6 = inlined_call_operand.vmem [shape: f32[1,8], index: 6, kind: input, shape index: {}]   ;;  %s435_s7 = inlined_call_operand.vmem [shape: f32[16,8], index: 7, kind: output, shape index: {}]  }
   0x1   :  { %300 = vmatprep.subr.bf16.mxu0 %v339_v0  ;;  %v330_v1 = vld [vmem:[%s428_s1] sm:$0xff]   ;;  %304 = vmatprep.mubr.msk.bf16.mxu0 %vm340_vm0, %v339_v0  ;;  %v331_v2 = vld [vmem:[%s428_s1 + $0x8] sm:$0xff]   ;;  %v335_v6 = vld [vmem:[%s429_s3 + $0x10] sm:$0xff]   ;;  %vm267_vm7 = vcmask 64512  }
   0x2   :  { %308 = vmatprep.subr.bf16.mxu1 %v339_v0  ;;  %316 = vmatprep.mubr.msk.bf16.mxu1 %vm340_vm0, %v339_v0  ;;  %v333_v3 = vld [vmem:[%s429_s3] sm:$0xff]   ;;  %v334_v5 = vld [vmem:[%s429_s3 + $0x8] sm:$0xff]   ;;  %v336_v7 = vld [vmem:[%s429_s3 + $0x18] sm:$0xff]  }
   0x3   :  { %301 = vmatpush3.bf16.msra.mxu0 %v330_v1  ;;  %v332_v4 = vld [vmem:[%s430_s0] sm:$0xff]   ;;  %309 = vmatpush3.bf16.msra.mxu1 %v333_v3  ;;  %v338_v21 = vld [vmem:[%s432_s5 + $0x8] sm:$0xff]  }
   0x4   :  { %302 = vmatprep.subr.bf16.mxu0 %v339_v0  ;;  %310 = vmatprep.subr.bf16.mxu1 %v339_v0  ;;  %v274_v8 = vld [vmem:[%s431_s2] ss:$0 sm:$0xff] }
   0x5   :  { %v337_v20 = vld [vmem:[%s432_s5] sm:$0xff]  }
   0x6   :  { %v279_v22 = vld [vmem:[%s433_s4] ss:$0 sm:$0xff] }
   0x7   :  { %303 = vmatpush3.bf16.msra.mxu0 %v331_v2  ;;  %311 = vmatpush3.bf16.msra.mxu1 %v334_v5  ;;  %v285_v34 = vld [vmem:[%s434_s6] ss:$0 sm:$0xff] }
   0x8   :  { %320 = vmatprep.subr.bf16.mxu0 %v339_v0  ;;  %312 = vmatprep.subr.bf16.mxu1 %v339_v0 }
   0xa   :  { %305 = vmatmul.mubr.msk.bf16.vlgmr.msra.gmra.mrb[0].mxu0 %vm57_vm1, %v332_v4 }
   0xb   :  { %324 = vmatprep.mubr.msk.bf16.mxu0 %vm340_vm0, %v339_v0  ;;  %313 = vmatpush3.bf16.msra.mxu1 %v335_v6 }
   0xc   :  { %314 = vmatprep.subr.bf16.mxu1 %v339_v0  ;;  %321 = vmatpush3.bf16.msra.mxu0 %v337_v20 }
   0xd   :  { %322 = vmatprep.subr.bf16.mxu0 %v339_v0 }
   0xf   :  { %315 = vmatpush3.bf16.msra.mxu1 %v336_v7 }
  0x10   :  { %323 = vmatpush3.bf16.msra.mxu0 %v338_v21 }
  0xdd   :  { %v95_v9 = vpop.f32.mrb[0].mxu0 }
  0xde   :  { %v96_v10 = vadd.f32 %v274_v8, %v95_v9  ;;  %v306_v11 = vpop.f32.mrb[1].mxu0 }
  0xdf   :  { %v98_v12 = vpop.f32.mrb[2].mxu0 }
  0xe0   :  { %v104_v13 = vmul.f32 0.01, %v96_v10  ;;  %v99_v14 = vadd.f32 %v274_v8, %v98_v12  ;;  %v307_v15 = vpop.f32.mrb[3].mxu0  ;;  %vm102_vm2 = vcmp.gt.f32.partialorder %v96_v10, 0.0 }
  0xe2   :  { %vm103_vm3 = vcmp.gt.f32.partialorder %v99_v14, 0.0  ;;  %v105_v16 = vmul.f32 0.01, %v99_v14  ;;  %v106_v17 = vsel %vm102_vm2, %v96_v10, %v104_v13 }
  0xe4   :  { %v107_v18 = vsel %vm103_vm3, %v99_v14, %v105_v16 }
  0xe5   :  { %v108_v19 = vpack.c.bf16 %v107_v18, %v106_v17 }
  0xe7   :  { %317 = vmatmul.mubr.msk.bf16.vlgmr.msra.gmra.mrb[0].mxu1 %vm148_vm4, %v108_v19 }
 0x1ba   :  { %v186_v23 = vpop.f32.mrb[0].mxu1 }
 0x1bb   :  { %v187_v24 = vadd.f32 %v279_v22, %v186_v23  ;;  %v318_v25 = vpop.f32.mrb[1].mxu1 }
 0x1bc   :  { %v189_v26 = vpop.f32.mrb[2].mxu1 }
 0x1bd   :  { %v195_v27 = vmul.f32 0.01, %v187_v24  ;;  %v190_v28 = vadd.f32 %v279_v22, %v189_v26  ;;  %v319_v29 = vpop.f32.mrb[3].mxu1  ;;  %vm193_vm5 = vcmp.gt.f32.partialorder %v187_v24, 0.0 }
 0x1bf   :  { %vm194_vm6 = vcmp.gt.f32.partialorder %v190_v28, 0.0  ;;  %v196_v30 = vmul.f32 0.01, %v190_v28  ;;  %v197_v31 = vsel %vm193_vm5, %v187_v24, %v195_v27 }
 0x1c1   :  { %v198_v32 = vsel %vm194_vm6, %v190_v28, %v196_v30 }
 0x1c2   :  { %v199_v33 = vpack.c.bf16 %v198_v32, %v197_v31 }
 0x1c4   :  { %325 = vmatmul.mubr.msk.bf16.vlgmr.msra.gmra.mrb[4].mxu0 %vm57_vm1, %v199_v33 }
 0x297   :  { %v260_v35 = vpop.f32.mrb[4].mxu0 }
 0x298   :  { %v261_v36 = vadd.f32 %v285_v34, %v260_v35  ;;  %v326_v37 = vpop.f32.mrb[5].mxu0 }
 0x299   :  { %v263_v38 = vpop.f32.mrb[6].mxu0 }
 0x29a   :  { %268 = vst.msk [vmem:[%s435_s7] sm:$0xff] %vm267_vm7, %v261_v36  ;;  %v264_v39 = vadd.f32 %v285_v34, %v263_v38  ;;  %v327_v40 = vpop.f32.mrb[7].mxu0 }
 0x29c   :  { %269 = vst.msk [vmem:[%s435_s7 + $0x8] sm:$0xff] %vm267_vm7, %v264_v39 }

</bundles_post_ra>
